<compile_context>
chip_gen: v5e
topology: v5e:2x2
jax: 0.10.0
libtpu: 0.0.40
codegen_flags: <defaults>
</compile_context>

<pallas_src>
import functools
import math

import jax
import jax.numpy as jnp
from jax import lax
from jax.experimental import pallas as pl
from jax.experimental.pallas import tpu as pltpu


_LANE = 128
_MAX_LANE_TILE = 32768          # lane-tile cap (multiple of 128)
_BLOCK_BYTES = 4 << 20          # per-input, per-buffer DMA block budget
_ACC_BYTES = 4 << 20            # combined budget for the 4 f32 accumulators
_VMEM_LIMIT_BYTES = 32 << 20    # safe scoped-VMEM request on v5e / v6e / v7x
_MAX_ROW_GROUPS = 128           # cap on row-groups folded per block


def _cdiv(a, b):
    return -(-a // b)


def _weighted_bce_kernel(p_ref, t_ref, out_ref,
                         acc_pl, acc_nl, acc_pc, acc_nc,
                         *, n_rows, n_cols, group):
    i = pl.program_id(0)               # row-block index ("parallel", megacore)
    j = pl.program_id(1)               # lane-block index (reduction, innermost)
    nj = pl.num_programs(1)

    br, bm = p_ref.shape               # static block shape
    k = br // group                    # row groups folded per block

    @pl.when(j == 0)
    def _init():
        acc_pl[...] = jnp.zeros_like(acc_pl)
        acc_nl[...] = jnp.zeros_like(acc_nl)
        acc_pc[...] = jnp.zeros_like(acc_pc)
        acc_nc[...] = jnp.zeros_like(acc_nc)

    x = p_ref[...].astype(jnp.float32)
    t = t_ref[...].astype(jnp.float32)

    # Numerically stable BCE-with-logits; exp / log1p go to the EUP slot.
    loss = jnp.maximum(x, 0.0) - x * t + jnp.log1p(jnp.exp(-jnp.abs(x)))
    pos = t > 0.5
    neg = t < 0.5

    def fold(v):                       # (br, bm) -> (group, bm); pure VPU adds
        if k == 1:
            return v
        return v.reshape(k, group, bm).sum(axis=0)

    def accumulate(pos_m, neg_m):
        acc_pl[...] += fold(jnp.where(pos_m, loss, 0.0))
        acc_nl[...] += fold(jnp.where(neg_m, loss, 0.0))
        acc_pc[...] += fold(jnp.where(pos_m, 1.0, 0.0))
        acc_nc[...] += fold(jnp.where(neg_m, 1.0, 0.0))

    row_tail = (n_rows % br) != 0
    lane_tail = (n_cols % bm) != 0

    if row_tail or lane_tail:
        # Boundary blocks read garbage beyond the true (n_rows, n_cols) extent;
        # mask it out.  The masked path only runs on boundary blocks.
        preds = []
        if row_tail:
            preds.append(i == pl.num_programs(0) - 1)
        if lane_tail:
            preds.append(j == nj - 1)
        is_tail = functools.reduce(jnp.logical_or, preds)

        @pl.when(is_tail)
        def _tail_blocks():
            valid = None
            if row_tail:
                rows = lax.broadcasted_iota(jnp.int32, (br, bm), 0) + i * br
                valid = rows < n_rows
            if lane_tail:
                cols = lax.broadcasted_iota(jnp.int32, (br, bm), 1) + j * bm
                cvalid = cols < n_cols
                valid = cvalid if valid is None else jnp.logical_and(valid, cvalid)
            accumulate(jnp.logical_and(pos, valid), jnp.logical_and(neg, valid))

        @pl.when(jnp.logical_not(is_tail))
        def _full_blocks():
            accumulate(pos, neg)
    else:
        accumulate(pos, neg)

    @pl.when(j == nj - 1)
    def _finalize():
        # Per-row-group partial sums for this row block (one cross-lane reduce
        # per block); the channel fold / divide / weight / sum is a tiny
        # epilogue in JAX.
        out_ref[0, 0] = jnp.sum(acc_pl[...], axis=-1, keepdims=True)
        out_ref[0, 1] = jnp.sum(acc_nl[...], axis=-1, keepdims=True)
        out_ref[0, 2] = jnp.sum(acc_pc[...], axis=-1, keepdims=True)
        out_ref[0, 3] = jnp.sum(acc_nc[...], axis=-1, keepdims=True)


def weighted_bce_loss(p, t, *, pos_frac=0.25):
    """WeightedBCE.forward(p, t) for NCHW logits / targets."""
    assert 0.0 < pos_frac < 1.0, "`pos_frac` must be between 0 and 1"
    assert p.shape == t.shape and p.ndim == 4
    N, C, H, W = p.shape
    M = H * W
    NR = N * C
    G = (8 * C) // math.gcd(8, C)      # lcm(8, C): sublane-aligned channel period

    # Free contiguous views; channel of row r is r % C.  No HBM pad / upcast:
    # the kernel casts per block and masks the row / lane tails in-register.
    p2 = p.reshape(NR, M)
    t2 = t.reshape(NR, M)

    if NR < G:
        # Degenerate tiny-batch case (N*C < lcm(8, C)): pad rows once up to one
        # sublane period.  t = 0.5 is excluded from both masks, so padding
        # contributes nothing.  (Tiny copy; the general path never pads.)
        p2 = jnp.pad(p2.astype(jnp.float32), ((0, G - NR), (0, 0)))
        t2 = jnp.pad(t2.astype(jnp.float32), ((0, G - NR), (0, 0)),
                     constant_values=0.5)
        NR = G

    itemsize = max(p2.dtype.itemsize, t2.dtype.itemsize)

    # Lane tile: multiple of 128, never exceeding M (tail masked in kernel),
    # bounded by the accumulator / per-block DMA budgets.
    if M < _LANE:
        BM = M
    else:
        bm_acc = max(_LANE, (_ACC_BYTES // (16 * G)) // _LANE * _LANE)
        bm_blk = max(_LANE, (_BLOCK_BYTES // (G * itemsize)) // _LANE * _LANE)
        BM = min((M // _LANE) * _LANE, _MAX_LANE_TILE, bm_acc, bm_blk)

    # Row tile: a multiple of lcm(8, C) so every vreg sublane is used and the
    # row -> channel mapping is block-invariant; never exceeds NR.
    k = max(1, min(_BLOCK_BYTES // (G * BM * itemsize), _MAX_ROW_GROUPS, NR // G))
    BR = k * G

    ni = _cdiv(NR, BR)
    nj = _cdiv(M, BM)

    kernel = functools.partial(_weighted_bce_kernel,
                               n_rows=NR, n_cols=M, group=G)

    partials = pl.pallas_call(
        kernel,
        out_shape=jax.ShapeDtypeStruct((ni, 4, G, 1), jnp.float32),
        grid_spec=pltpu.PrefetchScalarGridSpec(
            num_scalar_prefetch=0,
            grid=(ni, nj),
            in_specs=[
                pl.BlockSpec((BR, BM), lambda i, j: (i, j)),
                pl.BlockSpec((BR, BM), lambda i, j: (i, j)),
            ],
            out_specs=pl.BlockSpec((1, 4, G, 1), lambda i, j: (i, 0, 0, 0)),
            scratch_shapes=[pltpu.VMEM((G, BM), jnp.float32)] * 4,
        ),
        compiler_params=pltpu.CompilerParams(
            dimension_semantics=("parallel", "arbitrary"),
            vmem_limit_bytes=_VMEM_LIMIT_BYTES),
    )(p2, t2)

    # Tiny O(ni*G) epilogue in JAX: fold row groups (channel = group % C) into
    # channels, then the per-channel weighted normalization and final sum.
    parts = partials[:, :, :, 0].reshape(ni, 4, G // C, C).sum(axis=(0, 2))  # (4, C)
    eps = jnp.float32(1e-12)
    pf = jnp.float32(pos_frac)
    nf = jnp.float32(1.0 - pos_frac)
    return (pf * parts[0] / (parts[2] + eps)
            + nf * parts[1] / (parts[3] + eps)).sum()


def _reference(p, t, *, pos_frac=0.25):
    N, C, H, W = p.shape
    pf = jnp.transpose(p, (1, 0, 2, 3)).reshape(C, -1).astype(jnp.float32)
    tf = jnp.transpose(t, (1, 0, 2, 3)).reshape(C, -1).astype(jnp.float32)
    loss = jnp.maximum(pf, 0.0) - pf * tf + jnp.log1p(jnp.exp(-jnp.abs(pf)))
    pos = (tf > 0.5).astype(jnp.float32)
    neg = (tf < 0.5).astype(jnp.float32)
    pos_w = pos.sum(1) + 1e-12
    neg_w = neg.sum(1) + 1e-12
    loss = (pos_frac * pos * loss / pos_w[:, None]
            + (1.0 - pos_frac) * neg * loss / neg_w[:, None])
    return loss.sum()


if __name__ == "__main__":
    key = jax.random.PRNGKey(0)
    # Shapes cover: clean path (no tails), row+lane tail masking with C=3,
    # multi-row-group fold (k > 1), and the tiny-batch pad path.
    shapes = [(2, 4, 16, 16), (10, 3, 12, 12), (16, 4, 8, 8), (2, 3, 10, 10)]
    for idx, shape in enumerate(shapes):
        k1, k2 = jax.random.split(jax.random.fold_in(key, idx))
        p = jax.random.normal(k1, shape, dtype=jnp.float32)
        t = (jax.random.uniform(k2, shape) > 0.5).astype(jnp.float32)
        loss = jax.block_until_ready(weighted_bce_loss(p, t, pos_frac=0.25))
        ref = _reference(p, t, pos_frac=0.25)
        assert jnp.allclose(loss, ref, rtol=1e-5, atol=1e-5), (shape, loss, ref)
    print("KERNEL_OK")
</pallas_src>

<mosaic_0001>
module attributes {stable_mosaic.version = 11 : i64} {
  func.func @_weighted_bce_kernel(%arg0: i32, %arg1: i32, %arg2: memref<8x256xf32, #tpu.memory_space<vmem>>, %arg3: memref<8x256xf32, #tpu.memory_space<vmem>>, %arg4: memref<1x4x8x1xf32, #tpu.memory_space<vmem>>, %arg5: memref<8x256xf32, #tpu.memory_space<vmem>>, %arg6: memref<8x256xf32, #tpu.memory_space<vmem>>, %arg7: memref<8x256xf32, #tpu.memory_space<vmem>>, %arg8: memref<8x256xf32, #tpu.memory_space<vmem>>) attributes {dimension_semantics = [#tpu.dimension_semantics<parallel>, #tpu.dimension_semantics<arbitrary>], iteration_bounds = array<i64: 1, 1>, scalar_prefetch = 0 : i64, scratch_operands = 4 : i64, tpu.core_type = #tpu.core_type<tc>, window_params = [{transform_indices = @transform_0, window_bounds = array<i64: 8, 256>}, {transform_indices = @transform_1, window_bounds = array<i64: 8, 256>}, {transform_indices = @transform_2, window_bounds = array<i64: 1, 4, 8, 1>}]} {
    %c0_i32 = arith.constant 0 : i32
    %0 = arith.cmpi eq, %arg1, %c0_i32 : i32
    %1 = arith.extui %0 : i1 to i32
    %c0_i32_0 = arith.constant 0 : i32
    %2 = arith.cmpi ne, %1, %c0_i32_0 : i32
    scf.if %2 {
      %cst_31 = arith.constant 0.000000e+00 : f32
      %44 = vector.broadcast %cst_31 : f32 to vector<8x256xf32>
      %c0_32 = arith.constant 0 : index
      %c0_33 = arith.constant 0 : index
      %45 = vector.load %arg5[%c0_32, %c0_33] : memref<8x256xf32, #tpu.memory_space<vmem>>, vector<8x256xf32>
      tpu.vector_store %arg5[%c0_32, %c0_33], %44 {strides = array<i32>} : memref<8x256xf32, #tpu.memory_space<vmem>>, vector<8x256xf32>,
      %cst_34 = arith.constant 0.000000e+00 : f32
      %46 = vector.broadcast %cst_34 : f32 to vector<8x256xf32>
      %c0_35 = arith.constant 0 : index
      %c0_36 = arith.constant 0 : index
      %47 = vector.load %arg6[%c0_35, %c0_36] : memref<8x256xf32, #tpu.memory_space<vmem>>, vector<8x256xf32>
      tpu.vector_store %arg6[%c0_35, %c0_36], %46 {strides = array<i32>} : memref<8x256xf32, #tpu.memory_space<vmem>>, vector<8x256xf32>,
      %cst_37 = arith.constant 0.000000e+00 : f32
      %48 = vector.broadcast %cst_37 : f32 to vector<8x256xf32>
      %c0_38 = arith.constant 0 : index
      %c0_39 = arith.constant 0 : index
      %49 = vector.load %arg7[%c0_38, %c0_39] : memref<8x256xf32, #tpu.memory_space<vmem>>, vector<8x256xf32>
      tpu.vector_store %arg7[%c0_38, %c0_39], %48 {strides = array<i32>} : memref<8x256xf32, #tpu.memory_space<vmem>>, vector<8x256xf32>,
      %cst_40 = arith.constant 0.000000e+00 : f32
      %50 = vector.broadcast %cst_40 : f32 to vector<8x256xf32>
      %c0_41 = arith.constant 0 : index
      %c0_42 = arith.constant 0 : index
      %51 = vector.load %arg8[%c0_41, %c0_42] : memref<8x256xf32, #tpu.memory_space<vmem>>, vector<8x256xf32>
      tpu.vector_store %arg8[%c0_41, %c0_42], %50 {strides = array<i32>} : memref<8x256xf32, #tpu.memory_space<vmem>>, vector<8x256xf32>,
    } else {
    }
    %c0 = arith.constant 0 : index
    %c0_1 = arith.constant 0 : index
    %3 = vector.load %arg2[%c0, %c0_1] : memref<8x256xf32, #tpu.memory_space<vmem>>, vector<8x256xf32>
    %c0_2 = arith.constant 0 : index
    %c0_3 = arith.constant 0 : index
    %4 = vector.load %arg3[%c0_2, %c0_3] : memref<8x256xf32, #tpu.memory_space<vmem>>, vector<8x256xf32>
    %cst = arith.constant 0.000000e+00 : f32
    %5 = vector.broadcast %cst : f32 to vector<8x256xf32>
    %6 = arith.maximumf %3, %5 : vector<8x256xf32>
    %7 = arith.mulf %3, %4 : vector<8x256xf32>
    %8 = arith.subf %6, %7 : vector<8x256xf32>
    %9 = math.absf %3 : vector<8x256xf32>
    %cst_4 = arith.constant 0.000000e+00 : f32
    %10 = vector.broadcast %cst_4 : f32 to vector<8x256xf32>
    %11 = arith.subf %10, %9 : vector<8x256xf32>
    %12 = math.exp %11 : vector<8x256xf32>
    %13 = math.log1p %12 : vector<8x256xf32>
    %14 = arith.addf %8, %13 : vector<8x256xf32>
    %cst_5 = arith.constant 5.000000e-01 : f32
    %15 = vector.broadcast %cst_5 : f32 to vector<8x256xf32>
    %16 = arith.cmpf ogt, %4, %15 : vector<8x256xf32>
    %cst_6 = arith.constant 5.000000e-01 : f32
    %17 = vector.broadcast %cst_6 : f32 to vector<8x256xf32>
    %18 = arith.cmpf olt, %4, %17 : vector<8x256xf32>
    %c0_7 = arith.constant 0 : index
    %c0_8 = arith.constant 0 : index
    %19 = vector.load %arg5[%c0_7, %c0_8] : memref<8x256xf32, #tpu.memory_space<vmem>>, vector<8x256xf32>
    %cst_9 = arith.constant 0.000000e+00 : f32
    %20 = vector.broadcast %cst_9 : f32 to vector<8x256xf32>
    %21 = arith.select %16, %14, %20 : vector<8x256xi1>, vector<8x256xf32>
    %22 = arith.addf %19, %21 : vector<8x256xf32>
    %c0_10 = arith.constant 0 : index
    %c0_11 = arith.constant 0 : index
    %23 = vector.load %arg5[%c0_10, %c0_11] : memref<8x256xf32, #tpu.memory_space<vmem>>, vector<8x256xf32>
    tpu.vector_store %arg5[%c0_10, %c0_11], %22 {strides = array<i32>} : memref<8x256xf32, #tpu.memory_space<vmem>>, vector<8x256xf32>,
    %c0_12 = arith.constant 0 : index
    %c0_13 = arith.constant 0 : index
    %24 = vector.load %arg6[%c0_12, %c0_13] : memref<8x256xf32, #tpu.memory_space<vmem>>, vector<8x256xf32>
    %cst_14 = arith.constant 0.000000e+00 : f32
    %25 = vector.broadcast %cst_14 : f32 to vector<8x256xf32>
    %26 = arith.select %18, %14, %25 : vector<8x256xi1>, vector<8x256xf32>
    %27 = arith.addf %24, %26 : vector<8x256xf32>
    %c0_15 = arith.constant 0 : index
    %c0_16 = arith.constant 0 : index
    %28 = vector.load %arg6[%c0_15, %c0_16] : memref<8x256xf32, #tpu.memory_space<vmem>>, vector<8x256xf32>
    tpu.vector_store %arg6[%c0_15, %c0_16], %27 {strides = array<i32>} : memref<8x256xf32, #tpu.memory_space<vmem>>, vector<8x256xf32>,
    %c0_17 = arith.constant 0 : index
    %c0_18 = arith.constant 0 : index
    %29 = vector.load %arg7[%c0_17, %c0_18] : memref<8x256xf32, #tpu.memory_space<vmem>>, vector<8x256xf32>
    %cst_19 = arith.constant 1.000000e+00 : f32
    %cst_20 = arith.constant 0.000000e+00 : f32
    %30 = vector.broadcast %cst_19 : f32 to vector<8x256xf32>
    %31 = vector.broadcast %cst_20 : f32 to vector<8x256xf32>
    %32 = arith.select %16, %30, %31 : vector<8x256xi1>, vector<8x256xf32>
    %33 = arith.addf %29, %32 : vector<8x256xf32>
    %c0_21 = arith.constant 0 : index
    %c0_22 = arith.constant 0 : index
    %34 = vector.load %arg7[%c0_21, %c0_22] : memref<8x256xf32, #tpu.memory_space<vmem>>, vector<8x256xf32>
    tpu.vector_store %arg7[%c0_21, %c0_22], %33 {strides = array<i32>} : memref<8x256xf32, #tpu.memory_space<vmem>>, vector<8x256xf32>,
    %c0_23 = arith.constant 0 : index
    %c0_24 = arith.constant 0 : index
    %35 = vector.load %arg8[%c0_23, %c0_24] : memref<8x256xf32, #tpu.memory_space<vmem>>, vector<8x256xf32>
    %cst_25 = arith.constant 1.000000e+00 : f32
    %cst_26 = arith.constant 0.000000e+00 : f32
    %36 = vector.broadcast %cst_25 : f32 to vector<8x256xf32>
    %37 = vector.broadcast %cst_26 : f32 to vector<8x256xf32>
    %38 = arith.select %18, %36, %37 : vector<8x256xi1>, vector<8x256xf32>
    %39 = arith.addf %35, %38 : vector<8x256xf32>
    %c0_27 = arith.constant 0 : index
    %c0_28 = arith.constant 0 : index
    %40 = vector.load %arg8[%c0_27, %c0_28] : memref<8x256xf32, #tpu.memory_space<vmem>>, vector<8x256xf32>
    tpu.vector_store %arg8[%c0_27, %c0_28], %39 {strides = array<i32>} : memref<8x256xf32, #tpu.memory_space<vmem>>, vector<8x256xf32>,
    %c0_i32_29 = arith.constant 0 : i32
    %41 = arith.cmpi eq, %arg1, %c0_i32_29 : i32
    %42 = arith.extui %41 : i1 to i32
    %c0_i32_30 = arith.constant 0 : i32
    %43 = arith.cmpi ne, %42, %c0_i32_30 : i32
    scf.if %43 {
      %c0_31 = arith.constant 0 : index
      %c0_32 = arith.constant 0 : index
      %44 = vector.load %arg5[%c0_31, %c0_32] : memref<8x256xf32, #tpu.memory_space<vmem>>, vector<8x256xf32>
      %cst_33 = arith.constant dense<0.000000e+00> : vector<8xf32>
      %45 = vector.multi_reduction <add>, %44, %cst_33 [1] : vector<8x256xf32> to vector<8xf32>
      %46 = vector.shape_cast %45 : vector<8xf32> to vector<8x1xf32>
      %c0_34 = arith.constant 0 : index
      %c0_35 = arith.constant 0 : index
      %c0_36 = arith.constant 0 : index
      %c0_37 = arith.constant 0 : index
      %47 = vector.load %arg4[%c0_34, %c0_35, %c0_36, %c0_37] : memref<1x4x8x1xf32, #tpu.memory_space<vmem>>, vector<1x1x8x1xf32>
      %48 = vector.shape_cast %47 : vector<1x1x8x1xf32> to vector<8x1xf32>
      %49 = vector.shape_cast %46 : vector<8x1xf32> to vector<1x1x8x1xf32>
      tpu.vector_store %arg4[%c0_34, %c0_35, %c0_36, %c0_37], %49 {strides = array<i32>} : memref<1x4x8x1xf32, #tpu.memory_space<vmem>>, vector<1x1x8x1xf32>,
      %c0_38 = arith.constant 0 : index
      %c0_39 = arith.constant 0 : index
      %50 = vector.load %arg6[%c0_38, %c0_39] : memref<8x256xf32, #tpu.memory_space<vmem>>, vector<8x256xf32>
      %cst_40 = arith.constant dense<0.000000e+00> : vector<8xf32>
      %51 = vector.multi_reduction <add>, %50, %cst_40 [1] : vector<8x256xf32> to vector<8xf32>
      %52 = vector.shape_cast %51 : vector<8xf32> to vector<8x1xf32>
      %c0_41 = arith.constant 0 : index
      %c1 = arith.constant 1 : index
      %c0_42 = arith.constant 0 : index
      %c0_43 = arith.constant 0 : index
      %53 = vector.load %arg4[%c0_41, %c1, %c0_42, %c0_43] : memref<1x4x8x1xf32, #tpu.memory_space<vmem>>, vector<1x1x8x1xf32>
      %54 = vector.shape_cast %53 : vector<1x1x8x1xf32> to vector<8x1xf32>
      %55 = vector.shape_cast %52 : vector<8x1xf32> to vector<1x1x8x1xf32>
      tpu.vector_store %arg4[%c0_41, %c1, %c0_42, %c0_43], %55 {strides = array<i32>} : memref<1x4x8x1xf32, #tpu.memory_space<vmem>>, vector<1x1x8x1xf32>,
      %c0_44 = arith.constant 0 : index
      %c0_45 = arith.constant 0 : index
      %56 = vector.load %arg7[%c0_44, %c0_45] : memref<8x256xf32, #tpu.memory_space<vmem>>, vector<8x256xf32>
      %cst_46 = arith.constant dense<0.000000e+00> : vector<8xf32>
      %57 = vector.multi_reduction <add>, %56, %cst_46 [1] : vector<8x256xf32> to vector<8xf32>
      %58 = vector.shape_cast %57 : vector<8xf32> to vector<8x1xf32>
      %c0_47 = arith.constant 0 : index
      %c2 = arith.constant 2 : index
      %c0_48 = arith.constant 0 : index
      %c0_49 = arith.constant 0 : index
      %59 = vector.load %arg4[%c0_47, %c2, %c0_48, %c0_49] : memref<1x4x8x1xf32, #tpu.memory_space<vmem>>, vector<1x1x8x1xf32>
      %60 = vector.shape_cast %59 : vector<1x1x8x1xf32> to vector<8x1xf32>
      %61 = vector.shape_cast %58 : vector<8x1xf32> to vector<1x1x8x1xf32>
      tpu.vector_store %arg4[%c0_47, %c2, %c0_48, %c0_49], %61 {strides = array<i32>} : memref<1x4x8x1xf32, #tpu.memory_space<vmem>>, vector<1x1x8x1xf32>,
      %c0_50 = arith.constant 0 : index
      %c0_51 = arith.constant 0 : index
      %62 = vector.load %arg8[%c0_50, %c0_51] : memref<8x256xf32, #tpu.memory_space<vmem>>, vector<8x256xf32>
      %cst_52 = arith.constant dense<0.000000e+00> : vector<8xf32>
      %63 = vector.multi_reduction <add>, %62, %cst_52 [1] : vector<8x256xf32> to vector<8xf32>
      %64 = vector.shape_cast %63 : vector<8xf32> to vector<8x1xf32>
      %c0_53 = arith.constant 0 : index
      %c3 = arith.constant 3 : index
      %c0_54 = arith.constant 0 : index
      %c0_55 = arith.constant 0 : index
      %65 = vector.load %arg4[%c0_53, %c3, %c0_54, %c0_55] : memref<1x4x8x1xf32, #tpu.memory_space<vmem>>, vector<1x1x8x1xf32>
      %66 = vector.shape_cast %65 : vector<1x1x8x1xf32> to vector<8x1xf32>
      %67 = vector.shape_cast %64 : vector<8x1xf32> to vector<1x1x8x1xf32>
      tpu.vector_store %arg4[%c0_53, %c3, %c0_54, %c0_55], %67 {strides = array<i32>} : memref<1x4x8x1xf32, #tpu.memory_space<vmem>>, vector<1x1x8x1xf32>,
    } else {
    }
    return
  }
  func.func @transform_0(%arg0: i32, %arg1: i32) -> (i32, i32) {
    %c0_i32 = arith.constant 0 : i32
    return %arg0, %arg1 : i32, i32
  }
  func.func @transform_1(%arg0: i32, %arg1: i32) -> (i32, i32) {
    %c0_i32 = arith.constant 0 : i32
    return %arg0, %arg1 : i32, i32
  }
  func.func @transform_2(%arg0: i32, %arg1: i32) -> (i32, i32, i32, i32) {
    %c0_i32 = arith.constant 0 : i32
    %c0_i32_0 = arith.constant 0 : i32
    %c0_i32_1 = arith.constant 0 : i32
    %c0_i32_2 = arith.constant 0 : i32
    return %arg0, %c0_i32, %c0_i32_0, %c0_i32_1 : i32, i32, i32, i32
  }
}

</mosaic_0001>

<bundles_post_ra>
// kernel: tpu_custom_call.1
= control target key start
LH: loop header
LB: loop body
LE: loop exit
PB: predicated region body
PF: predicated region fallthrough
CT: control target
= control target key end

     0   :  { %7 = vsyncpa [#allocation7], 0  ;;  %s272_s0 = inlined_call_operand.hbm [shape: f32[8,256], index: 0, kind: input, shape index: {}]   ;;  %s273_s1 = inlined_call_operand.hbm [shape: f32[8,256], index: 1, kind: input, shape index: {}]   ;;  %s274_s2 = inlined_call_operand.vmem [shape: f32[1,4,8,1], index: 2, kind: output, shape index: {}]  }
   0x1   :  { %s14_s11 = sshll.u32 %s272_s0, 4  ;;  %s15_s11 = int_to_ptr.hbm [resolvable:$true] %s14_s11 }
   0x2   :  { %8 = vsyncpa [#allocation9], 0  ;;  %s228_s12 = smov [#allocation6]   ;;  %s25_s16 = sshll.u32 %s273_s1, 4  ;;  %s26_s16 = int_to_ptr.hbm [resolvable:$true] %s25_s16 }
   0x3   :  { %s16_s13 = sshll.u32 %s228_s12, 4  ;;  %s229_s17 = smov [#allocation8]   ;;  %s17_s13 = int_to_ptr.vmem [resolvable:$true] %s16_s13 }
   0x4   :  { %19 = dma.hbm_to_vmem [thread:$0]  %s15_s11, 256, %s17_s13, [#allocation7]  }
   0x5   :  { %s27_s18 = sshll.u32 %s229_s17, 4  ;;  %s28_s18 = int_to_ptr.vmem [resolvable:$true] %s27_s18 }
   0x6   :  { %30 = dma.hbm_to_vmem [thread:$0]  %s26_s16, 256, %s28_s18, [#allocation9]  }
   0x7   :  { %224 = dma.done.wait [#allocation7], 256  }
   0x8   :  { %225 = vsyncadd [#allocation7], 4294967040 }
   0x9   :  { %226 = dma.done.wait [#allocation9], 256  }
   0xa   :  { %227 = vsyncadd [#allocation9], 4294967040  ;;  %v53_v0 = vld [vmem:[#allocation8] sm:$0xff]  ;;  %v54_v1 = vld [vmem:[#allocation8 + $0x8] sm:$0xff]  ;;  %v230_v5 = vmov 0.0   ;;  %vm133_vm6 = vcmask 7168  }
   0xb   :  { %v51_v2 = vld [vmem:[#allocation6] sm:$0xff]  ;;  %vm89_vm0 = vcmp.gt.f32.partialorder %v53_v0, 0.5  ;;  %vm90_vm1 = vcmp.gt.f32.partialorder %v54_v1, 0.5  ;;  %v52_v3 = vld [vmem:[#allocation6 + $0x8] sm:$0xff]  ;;  %vm91_vm2 = vcmp.lt.f32.partialorder %v53_v0, 0.5  ;;  %vm92_vm3 = vcmp.lt.f32.partialorder %v54_v1, 0.5 }
   0xc   :  { %v61_v4 = vand.u32 2147483647, %v51_v2  ;;  %v111_v6 = vsel %vm89_vm0, 1.0, %v230_v5  ;;  %v112_v7 = vsel %vm90_vm1, 1.0, %v230_v5  ;;  %v62_v8 = vand.u32 2147483647, %v52_v3 }
   0xd   :  { %v144_v9 = vadd.f32 %v112_v7, %v111_v6  ;;  %v119_v14 = vsel %vm91_vm2, 1.0, %v230_v5  ;;  %v120_v15 = vsel %vm92_vm3, 1.0, %v230_v5  ;;  %v57_v24 = vmul.f32 %v53_v0, %v51_v2 }
   0xe   :  { %v63_v10 = vsub.f32 0.0, %v61_v4  ;;  %v64_v11 = vsub.f32 0.0, %v62_v8  ;;  %v151_v16 = vadd.f32 %v120_v15, %v119_v14  ;;  %v55_v25 = vmax.f32 %v51_v2, 0.0 }
   0xf   :  { %145 = vadd.xlane.f32.xlu1 %v144_v9  ;;  %v58_v28 = vmul.f32 %v54_v1, %v52_v3  ;;  %v56_v29 = vmax.f32 %v52_v3, 0.0 }
  0x10   :  { %v65_v12 = vmul.f32 1.442695, %v63_v10  ;;  %v67_v13 = vmul.f32 1.442695, %v64_v11  ;;  %v59_v33 = vsub.f32 %v55_v25, %v57_v24 }
  0x11   :  { %v60_v36 = vsub.f32 %v56_v29, %v58_v28 }
  0x12   :  { %168 = vpow2.f32 %v65_v12 }
  0x13   :  { %170 = vpow2.f32 %v67_v13 }
  0x17   :  { %152 = vadd.xlane.f32.xlu1 %v151_v16 }
  0x18   :  { %v169_v17 = vpop.eup %168 }
  0x19   :  { %v171_v18 = vpop.eup %170  ;;  %v69_v19 = vadd.f32 1.0, %v169_v17  ;;  %v72_v20 = vmul.f32 -0.5, %v169_v17  ;;  %v75_v26 = vand.u32 2147483647, %v169_v17 }
  0x1a   :  { %v78_v21 = vadd.f32 1.0, %v171_v18  ;;  %v81_v22 = vmul.f32 -0.5, %v171_v18  ;;  %v84_v30 = vand.u32 2147483647, %v171_v18 }
  0x1b   :  { %172 = vlog2.f32 %v69_v19  ;;  %v73_v23 = vadd.f32 1.0, %v72_v20  ;;  %vm76_vm4 = vcmp.lt.f32.partialorder %v75_v26, 0.0004427343 }
  0x1c   :  { %174 = vlog2.f32 %v78_v21  ;;  %v82_v27 = vadd.f32 1.0, %v81_v22  ;;  %vm85_vm5 = vcmp.lt.f32.partialorder %v84_v30, 0.0004427343 }
  0x1d   :  { %v74_v31 = vmul.f32 %v169_v17, %v73_v23 }
  0x1e   :  { %v83_v34 = vmul.f32 %v171_v18, %v82_v27 }
  0x21   :  { %v173_v32 = vpop.eup %172 }
  0x22   :  { %v175_v35 = vpop.eup %174  ;;  %v71_v37 = vmul.f32 0.6931472, %v173_v32 }
  0x23   :  { %v80_v38 = vmul.f32 0.6931472, %v175_v35 }
  0x24   :  { %v77_v39 = vsel %vm76_vm4, %v74_v31, %v71_v37 }
  0x25   :  { %v86_v40 = vsel %vm85_vm5, %v83_v34, %v80_v38  ;;  %v87_v41 = vadd.f32 %v77_v39, %v59_v33 }
  0x26   :  { %v88_v42 = vadd.f32 %v86_v40, %v60_v36 }
  0x27   :  { %v95_v43 = vsel %vm89_vm0, %v87_v41, 0.0  ;;  %v103_v46 = vsel %vm91_vm2, %v87_v41, 0.0 }
  0x28   :  { %v96_v44 = vsel %vm90_vm1, %v88_v42, 0.0  ;;  %v104_v47 = vsel %vm92_vm3, %v88_v42, 0.0 }
  0x29   :  { %v130_v45 = vadd.f32 %v96_v44, %v95_v43  ;;  %v137_v48 = vadd.f32 %v104_v47, %v103_v46 }
  0x2b   :  { %131 = vadd.xlane.f32.xlu0 %v130_v45 }
  0x33   :  { %138 = vadd.xlane.f32.xlu0 %v137_v48 }
  0x82   :  { %v146_v49 = vpop.xlane.xlu1 %145 }
  0x83   :  { %163 = vst.msk [vmem:[%s274_s2 + $0x10] sm:$0xff] %vm133_vm6, %v146_v49 }
  0x8a   :  { %v153_v50 = vpop.xlane.xlu1 %152 }
  0x8b   :  { %164 = vst.msk [vmem:[%s274_s2 + $0x18] sm:$0xff] %vm133_vm6, %v153_v50 }
  0x9e   :  { %v132_v51 = vpop.xlane.xlu0 %131 }
  0x9f   :  { %134 = vst.msk [vmem:[%s274_s2] sm:$0xff] %vm133_vm6, %v132_v51 }
  0xa6   :  { %v139_v52 = vpop.xlane.xlu0 %138 }
  0xa7   :  { %162 = vst.msk [vmem:[%s274_s2 + $0x8] sm:$0xff] %vm133_vm6, %v139_v52 }
  0xa8   :  { %160 = vsyncpa [#allocation7], 1 }
  0xa9   :  { %161 = vsyncpa [#allocation9], 1 }

</bundles_post_ra>
